<compile_context>
chip_gen: v5e
topology: v5e:2x2
jax: 0.10.0
libtpu: 0.0.40
codegen_flags: <defaults>
</compile_context>

<pallas_src>
import jax
import jax.numpy as jnp
from jax.experimental import pallas as pl
from jax.experimental.pallas import tpu as pltpu

HIDDEN = 768
CATEGORY_NUM = 50
N_PAD = 128          # lane-dense padded output width (multiple of 128)
TM_MAX = 1024        # batch tile: amortizes ~0.35us/step, fits v5e/v6e/v7x scoped VMEM


def _round_up(x, m):
    return ((x + m - 1) // m) * m


def linear_kernel(x_ref, w_ref, b_ref, o_ref):
    # x: [TM, 768] f32 (cast to bf16 in-kernel, VPU op hidden under DMA),
    # w: [768, 128] bf16, b: [1, 128] f32 -> o: [TM, 128] f32
    x = x_ref[...].astype(jnp.bfloat16)
    acc = jnp.dot(x, w_ref[...], preferred_element_type=jnp.float32)
    o_ref[...] = (acc + b_ref[...]).astype(o_ref.dtype)


def prepare_linear_params(weight, bias):
    """One-time param prep (hoisted out of the forward path).

    weight: [768, 50] f32, bias: [50] f32 ->
    (w_padded [768, 128] bf16, b_padded [1, 128] f32)
    """
    w = jnp.pad(weight.astype(jnp.bfloat16),
                ((0, 0), (0, N_PAD - CATEGORY_NUM)))
    b2d = jnp.pad(bias.astype(jnp.float32),
                  (0, N_PAD - CATEGORY_NUM)).reshape(1, N_PAD)
    return w, b2d


def mlp_forward(pooled_feature, w_padded, b_padded):
    """pooled_feature: [B, 768] f32, pre-padded bf16 weight / f32 bias -> [B, 50] f32."""
    B = pooled_feature.shape[0]

    # Batch tile: >=2 grid steps where possible (v7x 2-TC sharding), cap at
    # TM_MAX, keep a multiple of 8 (sublane granularity).
    TM = min(TM_MAX, _round_up(max(1, -(-B // 2)), 8))
    grid = (pl.cdiv(B, TM),)
    n_blocks = grid[0]

    cost = pl.CostEstimate(
        flops=2 * n_blocks * TM * HIDDEN * N_PAD,     # what the MXU actually does
        transcendentals=0,
        bytes_accessed=(B * HIDDEN * 4                # x (f32, streamed once)
                        + HIDDEN * N_PAD * 2          # w (bf16, VMEM-resident)
                        + N_PAD * 4                   # bias (f32)
                        + B * N_PAD * 4),             # out (f32)
    )

    out_padded = pl.pallas_call(
        linear_kernel,
        out_shape=jax.ShapeDtypeStruct((B, N_PAD), jnp.float32),
        grid_spec=pl.GridSpec(
            grid=grid,
            in_specs=[
                pl.BlockSpec((TM, HIDDEN), lambda i: (i, 0)),       # x: tiled over batch
                pl.BlockSpec((HIDDEN, N_PAD), lambda i: (0, 0)),    # w: VMEM-resident
                pl.BlockSpec((1, N_PAD), lambda i: (0, 0)),         # bias: VMEM-resident
            ],
            out_specs=pl.BlockSpec((TM, N_PAD), lambda i: (i, 0)),
        ),
        compiler_params=pltpu.CompilerParams(
            dimension_semantics=("parallel",),   # shard batch tiles across TCs (v7x)
        ),
        cost_estimate=cost,
    )(pooled_feature, w_padded, b_padded)

    return out_padded[:, :CATEGORY_NUM]


if __name__ == "__main__":
    key = jax.random.PRNGKey(0)
    k_feat, k_w, k_b = jax.random.split(key, 3)

    B = 8  # small batch

    # Synthetic pooled BERT feature (stand-in for bert_description(...)[1]).
    pooled = jax.random.normal(k_feat, (B, HIDDEN), dtype=jnp.float32)

    # Deterministic Linear(768, 50) init (PyTorch-style uniform bound).
    bound = 1.0 / (HIDDEN ** 0.5)
    weight = jax.random.uniform(k_w, (HIDDEN, CATEGORY_NUM), jnp.float32,
                                minval=-bound, maxval=bound)
    bias = jax.random.uniform(k_b, (CATEGORY_NUM,), jnp.float32,
                              minval=-bound, maxval=bound)

    # Param prep done once (would live at module init in a real model).
    w_padded, b_padded = prepare_linear_params(weight, bias)

    out = mlp_forward(pooled, w_padded, b_padded)
    out = jax.block_until_ready(out)

    # Reference check against plain JAX (f32); bf16 operands => looser tolerance.
    ref = pooled @ weight + bias
    assert out.shape == (B, CATEGORY_NUM)
    assert jnp.allclose(out, ref, atol=3e-2, rtol=3e-2)

    print("KERNEL_OK")
</pallas_src>

<mosaic_0001>
module attributes {stable_mosaic.version = 11 : i64} {
  func.func @linear_kernel(%arg0: i32, %arg1: memref<8x768xf32, #tpu.memory_space<vmem>>, %arg2: memref<768x128xbf16, #tpu.memory_space<vmem>>, %arg3: memref<1x128xf32, #tpu.memory_space<vmem>>, %arg4: memref<8x128xf32, #tpu.memory_space<vmem>>) attributes {dimension_semantics = [#tpu.dimension_semantics<parallel>], iteration_bounds = array<i64: 1>, scalar_prefetch = 0 : i64, scratch_operands = 0 : i64, tpu.core_type = #tpu.core_type<tc>, window_params = [{transform_indices = @transform_0, window_bounds = array<i64: 8, 768>}, {pipeline_mode = #tpu.pipeline_mode<synchronous>, transform_indices = @transform_1, window_bounds = array<i64: 768, 128>}, {pipeline_mode = #tpu.pipeline_mode<synchronous>, transform_indices = @transform_2, window_bounds = array<i64: 1, 128>}, {transform_indices = @transform_3, window_bounds = array<i64: 8, 128>}]} {
    %c0 = arith.constant 0 : index
    %c0_0 = arith.constant 0 : index
    %0 = vector.load %arg1[%c0, %c0_0] : memref<8x768xf32, #tpu.memory_space<vmem>>, vector<8x768xf32>
    %1 = arith.truncf %0 : vector<8x768xf32> to vector<8x768xbf16>
    %c0_1 = arith.constant 0 : index
    %c0_2 = arith.constant 0 : index
    %2 = vector.load %arg2[%c0_1, %c0_2] : memref<768x128xbf16, #tpu.memory_space<vmem>>, vector<768x128xbf16>
    %cst = arith.constant dense<0.000000e+00> : vector<8x128xf32>
    %3 = tpu.matmul %1, %2, %cst {dimension_numbers = #tpu.dot_dimension_numbers<[1], [0], [0], [1], [0, 0, 1, 1], [], []>} : vector<8x768xbf16>, vector<768x128xbf16>, vector<8x128xf32> -> vector<8x128xf32>
    %c0_3 = arith.constant 0 : index
    %c0_4 = arith.constant 0 : index
    %4 = vector.load %arg3[%c0_3, %c0_4] : memref<1x128xf32, #tpu.memory_space<vmem>>, vector<1x128xf32>
    %5 = vector.broadcast %4 : vector<1x128xf32> to vector<8x128xf32>
    %6 = arith.addf %3, %5 : vector<8x128xf32>
    %c0_5 = arith.constant 0 : index
    %c0_6 = arith.constant 0 : index
    %7 = vector.load %arg4[%c0_5, %c0_6] : memref<8x128xf32, #tpu.memory_space<vmem>>, vector<8x128xf32>
    tpu.vector_store %arg4[%c0_5, %c0_6], %6 {strides = array<i32>} : memref<8x128xf32, #tpu.memory_space<vmem>>, vector<8x128xf32>,
    return
  }
  func.func @transform_0(%arg0: i32) -> (i32, i32) {
    %c0_i32 = arith.constant 0 : i32
    %c0_i32_0 = arith.constant 0 : i32
    return %arg0, %c0_i32 : i32, i32
  }
  func.func @transform_1(%arg0: i32) -> (i32, i32) {
    %c0_i32 = arith.constant 0 : i32
    %c0_i32_0 = arith.constant 0 : i32
    %c0_i32_1 = arith.constant 0 : i32
    return %c0_i32, %c0_i32_0 : i32, i32
  }
  func.func @transform_2(%arg0: i32) -> (i32, i32) {
    %c0_i32 = arith.constant 0 : i32
    %c0_i32_0 = arith.constant 0 : i32
    %c0_i32_1 = arith.constant 0 : i32
    return %c0_i32, %c0_i32_0 : i32, i32
  }
  func.func @transform_3(%arg0: i32) -> (i32, i32) {
    %c0_i32 = arith.constant 0 : i32
    %c0_i32_0 = arith.constant 0 : i32
    return %arg0, %c0_i32 : i32, i32
  }
}

</mosaic_0001>

<bundles_post_ra>
// kernel: tpu_custom_call.1
= control target key start
LH: loop header
LB: loop body
LE: loop exit
PB: predicated region body
PF: predicated region fallthrough
CT: control target
= control target key end

     0   :  { %8 = vsyncpa [#allocation3], 0  ;;  %s903_s0 = inlined_call_operand.hbm [shape: f32[8,768], index: 0, kind: input, shape index: {}]   ;;  %s904_s1 = inlined_call_operand.hbm [shape: bf16[768,128], index: 1, kind: input, shape index: {}]   ;;  %s905_s2 = inlined_call_operand.vmem [shape: f32[1,128], index: 2, kind: input, shape index: {}]   ;;  %s906_s3 = inlined_call_operand.hbm [shape: f32[8,128], index: 3, kind: output, shape index: {}]  }
   0x1   :  { %9 = vsyncpa [#allocation6], 0 }
   0x2   :  { %10 = vsyncpa [#allocation4], 0  ;;  %s16_s14 = sshll.u32 %s903_s0, 4  ;;  %s866_s15 = smov [#allocation2]   ;;  %s17_s14 = int_to_ptr.hbm [resolvable:$true] %s16_s14 }
   0x3   :  { %s18_s16 = sshll.u32 %s866_s15, 4  ;;  %s26_s19 = sshll.u32 %s904_s1, 4  ;;  %s19_s16 = int_to_ptr.vmem [resolvable:$true] %s18_s16  ;;  %s27_s19 = int_to_ptr.hbm [resolvable:$true] %s26_s19 }
   0x4   :  { %21 = dma.hbm_to_vmem [thread:$0]  %s17_s14, 768, %s19_s16, [#allocation3]  }
   0x5   :  { %s867_s20 = smov [#allocation5]   ;;  %s868_s22 = smov 64  }
   0x6   :  { %s28_s21 = sshll.u32 %s867_s20, 4  ;;  %s869_s23 = smov 4   ;;  %s29_s21 = int_to_ptr.vmem [resolvable:$true] %s28_s21 }
   0x7   :  { %34 = dma.hbm_to_vmem [thread:$0]  %s27_s19, 6144, %s29_s21, [#allocation6], %s868_s22, %s868_s22, %s869_s23  }
   0x8   :  { %860 = dma.done.wait [#allocation3], 768  }
   0x9   :  { %861 = vsyncadd [#allocation3], 4294966528 }
   0xa   :  { %862 = dma.done.wait [#allocation6], 6144  }
   0xb   :  { %863 = vsyncadd [#allocation6], 4294961152  ;;  %v741_v0 = vld [vmem:[#allocation5 + $0x38] sm:$0xff]  ;;  %v740_v2 = vld [vmem:[#allocation5 + $0x30] sm:$0xff]  ;;  %s870_s24 = smov [#allocation7]   ;;  %s531_s28 = sshll.u32 %s906_s3, 4  ;;  %s532_s28 = int_to_ptr.hbm [resolvable:$true] %s531_s28 }
   0xc   :  { %v749_v1 = vld [vmem:[#allocation5 + $0x78] sm:$0xff]  ;;  %445 = vmatpush.bf16.msra.mxu0 %v741_v0  ;;  %v748_v3 = vld [vmem:[#allocation5 + $0x70] sm:$0xff]  ;;  %v739_v8 = vld [vmem:[#allocation5 + $0x28] sm:$0xff]  ;;  %s529_s25 = sshll.u32 %s870_s24, 4  ;;  %s530_s25 = int_to_ptr.vmem [resolvable:$true] %s529_s25 }
   0xd   :  { %458 = vmatpush.bf16.msra.mxu1 %v749_v1  ;;  %v757_v4 = vld [vmem:[#allocation5 + $0xb8] sm:$0xff]  ;;  %v756_v6 = vld [vmem:[#allocation5 + $0xb0] sm:$0xff]  ;;  %v747_v9 = vld [vmem:[#allocation5 + $0x68] sm:$0xff] }
   0xe   :  { %v765_v5 = vld [vmem:[#allocation5 + $0xf8] sm:$0xff]  ;;  %471 = vmatpush.bf16.msra.mxu2 %v757_v4  ;;  %v764_v7 = vld [vmem:[#allocation5 + $0xf0] sm:$0xff]  ;;  %v755_v10 = vld [vmem:[#allocation5 + $0xa8] sm:$0xff] }
   0xf   :  { %484 = vmatpush.bf16.msra.mxu3 %v765_v5  ;;  %v763_v11 = vld [vmem:[#allocation5 + $0xe8] sm:$0xff]  ;;  %v738_v12 = vld [vmem:[#allocation5 + $0x20] sm:$0xff]  ;;  %v737_v16 = vld [vmem:[#allocation5 + $0x18] sm:$0xff] }
  0x10   :  { %446 = vmatpush.bf16.msra.mxu0 %v740_v2  ;;  %v746_v13 = vld [vmem:[#allocation5 + $0x60] sm:$0xff]  ;;  %v745_v17 = vld [vmem:[#allocation5 + $0x58] sm:$0xff]  ;;  %v736_v20 = vld [vmem:[#allocation5 + $0x10] sm:$0xff] }
  0x11   :  { %459 = vmatpush.bf16.msra.mxu1 %v748_v3  ;;  %v754_v14 = vld [vmem:[#allocation5 + $0xa0] sm:$0xff]  ;;  %v753_v18 = vld [vmem:[#allocation5 + $0x98] sm:$0xff]  ;;  %v744_v21 = vld [vmem:[#allocation5 + $0x50] sm:$0xff] }
  0x12   :  { %472 = vmatpush.bf16.msra.mxu2 %v756_v6  ;;  %v762_v15 = vld [vmem:[#allocation5 + $0xe0] sm:$0xff]  ;;  %v761_v19 = vld [vmem:[#allocation5 + $0xd8] sm:$0xff]  ;;  %v752_v22 = vld [vmem:[#allocation5 + $0x90] sm:$0xff] }
  0x13   :  { %485 = vmatpush.bf16.msra.mxu3 %v764_v7  ;;  %v760_v23 = vld [vmem:[#allocation5 + $0xd0] sm:$0xff]  ;;  %v735_v24 = vld [vmem:[#allocation5 + $0x8] sm:$0xff]  ;;  %v734_v28 = vld [vmem:[#allocation5] sm:$0xff] }
  0x14   :  { %447 = vmatpush.bf16.msra.mxu0 %v739_v8  ;;  %v743_v25 = vld [vmem:[#allocation5 + $0x48] sm:$0xff]  ;;  %v742_v29 = vld [vmem:[#allocation5 + $0x40] sm:$0xff]  ;;  %v45_v30 = vld [vmem:[#allocation2] sm:$0xff] }
  0x15   :  { %460 = vmatpush.bf16.msra.mxu1 %v747_v9  ;;  %v751_v26 = vld [vmem:[#allocation5 + $0x88] sm:$0xff]  ;;  %v46_v31 = vld [vmem:[#allocation2 + $0x8] sm:$0xff]  ;;  %v750_v34 = vld [vmem:[#allocation5 + $0x80] sm:$0xff]  ;;  %v51_v36 = vpack.c.bf16 %v45_v30, %v45_v30 }
  0x16   :  { %473 = vmatpush.bf16.msra.mxu2 %v755_v10  ;;  %v759_v27 = vld [vmem:[#allocation5 + $0xc8] sm:$0xff]  ;;  %v773_v32 = vld [vmem:[#allocation5 + $0x138] sm:$0xff]  ;;  %v758_v35 = vld [vmem:[#allocation5 + $0xc0] sm:$0xff]  ;;  %v52_v37 = vpack.c.bf16 %v46_v31, %v46_v31 }
  0x17   :  { %486 = vmatpush.bf16.msra.mxu3 %v763_v11  ;;  %v781_v33 = vld [vmem:[#allocation5 + $0x178] sm:$0xff]  ;;  %v47_v38 = vld [vmem:[#allocation2 + $0x10] sm:$0xff]  ;;  %v48_v39 = vld [vmem:[#allocation2 + $0x18] sm:$0xff] }
  0x18   :  { %448 = vmatpush.bf16.msra.mxu0 %v738_v12  ;;  %v772_v40 = vld [vmem:[#allocation5 + $0x130] sm:$0xff]  ;;  %v53_v42 = vpack.c.bf16 %v47_v38, %v47_v38  ;;  %v54_v43 = vpack.c.bf16 %v48_v39, %v48_v39  ;;  %v771_v44 = vld [vmem:[#allocation5 + $0x128] sm:$0xff]  ;;  %v770_v46 = vld [vmem:[#allocation5 + $0x120] sm:$0xff] }
  0x19   :  { %461 = vmatpush.bf16.msra.mxu1 %v746_v13  ;;  %v780_v41 = vld [vmem:[#allocation5 + $0x170] sm:$0xff]  ;;  %v779_v45 = vld [vmem:[#allocation5 + $0x168] sm:$0xff]  ;;  %v778_v47 = vld [vmem:[#allocation5 + $0x160] sm:$0xff] }
  0x1a   :  { %474 = vmatpush.bf16.msra.mxu2 %v754_v14  ;;  %v769_v48 = vld [vmem:[#allocation5 + $0x118] sm:$0xff]  ;;  %v768_v50 = vld [vmem:[#allocation5 + $0x110] sm:$0xff]  ;;  %v767_v52 = vld [vmem:[#allocation5 + $0x108] sm:$0xff] }
  0x1b   :  { %487 = vmatpush.bf16.msra.mxu3 %v762_v15  ;;  %v777_v49 = vld [vmem:[#allocation5 + $0x158] sm:$0xff]  ;;  %v776_v51 = vld [vmem:[#allocation5 + $0x150] sm:$0xff]  ;;  %v775_v53 = vld [vmem:[#allocation5 + $0x148] sm:$0xff] }
  0x1c   :  { %449 = vmatpush.bf16.msra.mxu0 %v737_v16  ;;  %v766_v54 = vld [vmem:[#allocation5 + $0x100] sm:$0xff]  ;;  %v49_v56 = vld [vmem:[#allocation2 + $0x20] sm:$0xff]  ;;  %v50_v57 = vld [vmem:[#allocation2 + $0x28] sm:$0xff] }
  0x1d   :  { %462 = vmatpush.bf16.msra.mxu1 %v745_v17  ;;  %v774_v55 = vld [vmem:[#allocation5 + $0x140] sm:$0xff]  ;;  %v55_v58 = vpack.c.bf16 %v49_v56, %v49_v56  ;;  %v56_v59 = vpack.c.bf16 %v50_v57, %v50_v57  ;;  %v787_v2 = vld [vmem:[%s905_s2] ss:$0 sm:$0xff] }
  0x1e   :  { %475 = vmatpush.bf16.msra.mxu2 %v753_v18 }
  0x1f   :  { %488 = vmatpush.bf16.msra.mxu3 %v761_v19 }
  0x20   :  { %450 = vmatpush.bf16.msra.mxu0 %v736_v20 }
  0x21   :  { %463 = vmatpush.bf16.msra.mxu1 %v744_v21 }
  0x22   :  { %476 = vmatpush.bf16.msra.mxu2 %v752_v22 }
  0x23   :  { %489 = vmatpush.bf16.msra.mxu3 %v760_v23 }
  0x24   :  { %451 = vmatpush.bf16.msra.mxu0 %v735_v24 }
  0x25   :  { %464 = vmatpush.bf16.msra.mxu1 %v743_v25 }
  0x26   :  { %477 = vmatpush.bf16.msra.mxu2 %v751_v26 }
  0x27   :  { %490 = vmatpush.bf16.msra.mxu3 %v759_v27 }
  0x28   :  { %452 = vmatpush.bf16.msra.mxu0 %v734_v28 }
  0x29   :  { %465 = vmatpush.bf16.msra.mxu1 %v742_v29 }
  0x2a   :  { %478 = vmatpush.bf16.msra.mxu2 %v750_v34 }
  0x2b   :  { %491 = vmatpush.bf16.msra.mxu3 %v758_v35  ;;  %453 = vmatmul.bf16.vlgmr.msra.gmra.mxu0 %v51_v36 }
  0x2c   :  { %497 = vmatpush.bf16.msrb.mxu0 %v773_v32  ;;  %466 = vmatmul.bf16.vlgmr.msra.gmra.mxu1 %v52_v37 }
  0x2d   :  { %510 = vmatpush.bf16.msrb.mxu1 %v781_v33  ;;  %479 = vmatmul.bf16.vlgmr.msra.gmra.mxu2 %v53_v42 }
  0x2e   :  { %492 = vmatmul.bf16.vlgmr.msra.gmra.mxu3 %v54_v43 }
  0x30   :  { %498 = vmatpush.bf16.msrb.mxu0 %v772_v40 }
  0x31   :  { %511 = vmatpush.bf16.msrb.mxu1 %v780_v41 }
  0x34   :  { %499 = vmatpush.bf16.msrb.mxu0 %v771_v44 }
  0x35   :  { %512 = vmatpush.bf16.msrb.mxu1 %v779_v45 }
  0x38   :  { %500 = vmatpush.bf16.msrb.mxu0 %v770_v46 }
  0x39   :  { %513 = vmatpush.bf16.msrb.mxu1 %v778_v47 }
  0x3c   :  { %501 = vmatpush.bf16.msrb.mxu0 %v769_v48 }
  0x3d   :  { %514 = vmatpush.bf16.msrb.mxu1 %v777_v49 }
  0x40   :  { %502 = vmatpush.bf16.msrb.mxu0 %v768_v50 }
  0x41   :  { %515 = vmatpush.bf16.msrb.mxu1 %v776_v51 }
  0x44   :  { %503 = vmatpush.bf16.msrb.mxu0 %v767_v52 }
  0x45   :  { %516 = vmatpush.bf16.msrb.mxu1 %v775_v53 }
  0x48   :  { %504 = vmatpush.bf16.msrb.mxu0 %v766_v54 }
  0x49   :  { %517 = vmatpush.bf16.msrb.mxu1 %v774_v55 }
  0x4b   :  { %505 = vmatmul.bf16.vlgmr.msrb.gmra.mxu0 %v55_v58 }
  0x4c   :  { %518 = vmatmul.bf16.vlgmr.msrb.gmra.mxu1 %v56_v59 }
  0xa8   :  { %v454_v60 = vpop.f32.mrf.mxu0 }
  0xa9   :  { %v467_v61 = vpop.f32.mrf.mxu1  ;;  %v455_v3 = vadd.f32 %v787_v2, %v454_v60 }
  0xab   :  { %v468_v6 = vadd.f32 %v467_v61, %v455_v3 }
  0xb0   :  { %v456_v62 = vpop.f32.mrf.mxu0  ;;  %v480_v0 = vpop.f32.mrf.mxu2 }
  0xb1   :  { %v469_v63 = vpop.f32.mrf.mxu1  ;;  %v493_v1 = vpop.f32.mrf.mxu3  ;;  %v481_v7 = vadd.f32 %v480_v0, %v468_v6 }
  0xb3   :  { %v494_v8 = vadd.f32 %v493_v1, %v481_v7 }
  0xb8   :  { %v482_v4 = vpop.f32.mrf.mxu2 }
  0xb9   :  { %v495_v5 = vpop.f32.mrf.mxu3 }
  0xc8   :  { %v506_v9 = vpop.f32.mrf.mxu0 }
  0xc9   :  { %v519_v10 = vpop.f32.mrf.mxu1  ;;  %v507_v11 = vadd.f32 %v506_v9, %v494_v8 }
  0xcb   :  { %v520_v12 = vadd.f32 %v519_v10, %v507_v11 }
  0xcd   :  { %523 = vst [vmem:[#allocation7] sm:$0xff] %v520_v12 }
  0xce   :  { %534 = dma.vmem_to_hbm [thread:$0]  %s530_s25, 128, %s532_s28, [#allocation4]  }
  0xd0   :  { %v508_v13 = vpop.f32.mrf.mxu0 }
  0xd1   :  { %v521_v14 = vpop.f32.mrf.mxu1 }
  0xd2   :  { %864 = dma.done.wait [#allocation4], 128  }
  0xd3   :  { %865 = vsyncadd [#allocation4], 4294967168 }
  0xd4   :  { %539 = vsyncpa [#allocation3], 1 }
  0xd5   :  { %540 = vsyncpa [#allocation6], 1 }
  0xd6   :  { %541 = vsyncpa [#allocation4], 1 }

</bundles_post_ra>
